<compile_context>
chip_gen: v7x
topology: tpu7x:2x2x1
jax: 0.10.0
libtpu: 0.0.40
codegen_flags: <defaults>
</compile_context>

<pallas_src>
import functools

import jax
import jax.numpy as jnp
from jax import lax
from jax.experimental import pallas as pl
from jax.experimental.pallas import tpu as pltpu

FULL_DIM = 768     # init `dim` (forced by the hard-coded 768/1536 offsets in forward)
HEAD_DIM = 64      # self.head_dim (num_heads = subset_dim / 64)


def _attention_kernel(x_ref, wqkv_t_ref, bqkv_ref, wproj_t_ref, bproj_ref, o_ref, attn_buf,
                      *, num_heads, head_dim):
    """Fused QKV proj + multi-head softmax attention + output proj for one batch tile.

    x_ref:       (TB, N, D)    input tokens (TB batch elements per grid step)
    wqkv_t_ref:  (D, 3D)       sub qkv weight, (in, out), scale folded into Q cols; MXU dtype
    bqkv_ref:    (1, 3D)       sub qkv bias (f32, Q part pre-scaled)
    wproj_t_ref: (D, D)        sub proj weight, (in, out); MXU dtype
    bproj_ref:   (1, D)        sub proj bias (f32)
    o_ref:       (TB, N, D)    output
    attn_buf:    (TB*N, D)     VMEM scratch: per-head attention outputs assembled here so the
                               output projection is a single K=D matmul after the head loop
    """
    tb, n, d = x_ref.shape
    cdt = wqkv_t_ref.dtype              # MXU operand dtype (bf16 recommended on v5e/v6e/v7x)

    # --- QKV projection: one big-M matmul (TB*N, D) @ (D, 3D), f32 accumulation ---
    x2 = x_ref[...].reshape(tb * n, d).astype(cdt)
    qkv = jnp.dot(x2, wqkv_t_ref[...], preferred_element_type=jnp.float32)
    qkv = qkv + bqkv_ref[...].astype(jnp.float32)            # (TB*N, 3D)
    qkv3 = qkv.reshape(tb, n, 3 * d)                          # batch dim back for attention

    # --- per-head attention, batched over the batch tile -------------------------------
    # Static Python loop over heads with static lane slices (head_dim=64). Both S = q.k^T and
    # P.v are dot_generals with batch dim = batch tile and contraction over head_dim / keys,
    # so no explicit k.T transpose is emitted. Each head's output lands in `attn_buf` at its
    # static lane offset, so the only cross-iteration state lives in VMEM (not vregs) and no
    # per-head K=64 projection matmuls / lane concatenations are needed.
    # TODO(synk): at full H=12, check a bundle dump for vld/vst spill traffic and, if present,
    # switch to lax.fori_loop(..., unroll=True) with dynamic-lane stores; kept statically
    # unrolled here because static lane offsets are the compile-safe path.
    # TODO(synk): for ViT-scale N (197/577), tile over keys with an online-softmax
    # accumulator instead of materialising the full (TB, N, N) f32 score block, and consider
    # a one-shot (TB*H, N, 64) relayout of q/k/v to replace the per-head mid-tile lane slices.
    for h in range(num_heads):
        lo = h * head_dim
        q_h = qkv3[:, :, 0 * d + lo:0 * d + lo + head_dim].astype(cdt)   # scale pre-folded
        k_h = qkv3[:, :, 1 * d + lo:1 * d + lo + head_dim].astype(cdt)
        v_h = qkv3[:, :, 2 * d + lo:2 * d + lo + head_dim].astype(cdt)

        # scores (TB, N, N): contraction over head_dim (no explicit k transpose)
        s = lax.dot_general(q_h, k_h, (((2,), (2,)), ((0,), (0,))),
                            preferred_element_type=jnp.float32)
        s = s - jnp.max(s, axis=-1, keepdims=True)
        p = jnp.exp(s)                                                        # f32 (EUP)
        p = p * pl.reciprocal(jnp.sum(p, axis=-1, keepdims=True), approx=True)  # EUP, no div

        # P @ V: (TB, N, hd), contraction over keys
        o_h = lax.dot_general(p.astype(cdt), v_h, (((2,), (1,)), ((0,), (0,))),
                              preferred_element_type=jnp.float32)

        # assemble the per-head output at its static lane offset (every lane of attn_buf is
        # overwritten each grid step, so no zero-init is required)
        attn_buf[:, lo:lo + head_dim] = o_h.reshape(tb * n, head_dim).astype(attn_buf.dtype)

    # --- output projection: ONE (TB*N, D) @ (D, D) matmul with K = D --------------------
    out = jnp.dot(attn_buf[...], wproj_t_ref[...], preferred_element_type=jnp.float32)
    out = out + bproj_ref[...].astype(jnp.float32)
    o_ref[...] = out.reshape(tb, n, d).astype(o_ref.dtype)


def prepare_subnetwork_params(qkv_w, qkv_b, proj_w, proj_b, subset_dim, *,
                              mxu_dtype=jnp.bfloat16):
    """Sub-network extraction (mirrors the torch.cat slicing with 768/1536 offsets), weight
    transpose to (in, out), attention-scale folding, and MXU-dtype cast.

    Call ONCE per (subset_dim, dtype) configuration and reuse across forwards: these
    slice/concat/transpose/cast ops are separate un-hidden XLA ops (~10-19 MB of HBM traffic
    at D=768) that would otherwise dominate wall-clock at small batch.

    bf16 MXU operands are the right default on ALL generations (v5e's MXU runs bf16 at full
    197 TF/s; only its VPU/EUP lack bf16, and softmax/accumulation in the kernel stays f32).
    Pass mxu_dtype=jnp.float32 only when bit-tighter parity with an f32 reference is needed.
    """
    sd = int(subset_dim)
    assert sd % HEAD_DIM == 0 and 0 < sd <= FULL_DIM
    scale = float(HEAD_DIM) ** -0.5                      # self.scale = head_dim ** -0.5 (=0.125)

    sub_qkv_w = jnp.concatenate(
        [qkv_w[0 * FULL_DIM:0 * FULL_DIM + sd, :sd],
         qkv_w[1 * FULL_DIM:1 * FULL_DIM + sd, :sd],
         qkv_w[2 * FULL_DIM:2 * FULL_DIM + sd, :sd]], axis=0).astype(jnp.float32)  # (3*sd, sd)
    sub_qkv_b = jnp.concatenate(
        [qkv_b[0 * FULL_DIM:0 * FULL_DIM + sd],
         qkv_b[1 * FULL_DIM:1 * FULL_DIM + sd],
         qkv_b[2 * FULL_DIM:2 * FULL_DIM + sd]], axis=0).astype(jnp.float32)       # (3*sd,)

    # Fold the attention scale into the Q block: (x @ Wq.T + bq) * scale == x @ (s*Wq).T + s*bq.
    # Done in f32 before the MXU-dtype cast (scale = 0.125 is exact in every float dtype).
    q_scale = jnp.concatenate([jnp.full((sd,), scale, jnp.float32),
                               jnp.ones((2 * sd,), jnp.float32)])
    sub_qkv_w = sub_qkv_w * q_scale[:, None]
    sub_qkv_b = sub_qkv_b * q_scale

    # Pre-transpose to (in, out) so the kernel does x @ W directly (F.linear = x @ W.T).
    wqkv_t = sub_qkv_w.T.astype(mxu_dtype)                               # (sd, 3*sd)
    wproj_t = proj_w[:sd, :sd].astype(jnp.float32).T.astype(mxu_dtype)   # (sd, sd)
    bqkv = sub_qkv_b.reshape(1, -1)                                      # (1, 3*sd) f32
    bproj = proj_b[:sd].astype(jnp.float32).reshape(1, -1)               # (1, sd)   f32
    return wqkv_t, bqkv, wproj_t, bproj


def _pick_batch_tile(B, N, max_rows):
    """Batch tile: as many rows per grid step as allowed (amortises the ~0.35us/step overhead
    and keeps MXU M large), but keep >= 2 grid steps whenever B >= 2 so v7x's two TensorCores
    both get work."""
    max_tb = B if B < 2 else B // 2
    best = 1
    for tb in range(1, max(max_tb, 1) + 1):
        if B % tb == 0 and tb * N <= max_rows:
            best = tb
    return best


def _resident_spec(shape):
    """Weight/bias blocks with a constant index_map are never re-fetched: request
    single-buffering (saves ~half their VMEM vs the default double buffer — ~4.7 MB bf16 /
    ~9.4 MB f32 at D=768, the easiest VMEM win on v7x's 64 MiB)."""
    index_map = lambda b: (0,) * len(shape)
    try:
        return pl.BlockSpec(shape, index_map, pipeline_mode=pl.Buffered(1))
    except (TypeError, AttributeError):        # very old jax without pipeline_mode support
        return pl.BlockSpec(shape, index_map)


def modified_attention_forward(x, wqkv_t, bqkv, wproj_t, bproj, *,
                               batch_tile=None, max_rows_per_step=1024,
                               vmem_limit_bytes=48 * 1024 * 1024):
    """Mirrors ModifiedAttention.forward after configure_subnetwork(subset_dim), taking the
    cached params from prepare_subnetwork_params. attn_drop/proj_drop = 0.0 (inference).

    Tuning notes: on v6e/v5e (128 MiB VMEM) max_rows_per_step and vmem_limit_bytes can be
    raised further; on v7x keep vmem_limit_bytes <= ~48 MiB (64 MiB physical) — prefer bf16
    MXU operands (the prepare default) or a smaller tile for full-D f32 configs.
    """
    B, N, C = x.shape
    D = wproj_t.shape[0]
    assert C == D, "input channel dim must equal the configured subset dim"
    assert wqkv_t.shape == (D, 3 * D) and bqkv.shape == (1, 3 * D) and bproj.shape == (1, D)
    num_heads = D // HEAD_DIM                               # int(current_subset_dim / 64)

    TB = batch_tile if batch_tile is not None else _pick_batch_tile(B, N, max_rows_per_step)
    assert B % TB == 0, "batch tile must divide the batch"
    # TODO(synk): when B == 1 the grid has a single step and one v7x TensorCore idles; split
    # the grid over query tiles (with a key-tiled online softmax) or heads in that case.

    kernel = functools.partial(_attention_kernel, num_heads=num_heads, head_dim=HEAD_DIM)

    nbytes = lambda a: int(a.size) * a.dtype.itemsize
    flops = (2 * B * N * D * 3 * D                          # QKV projection
             + 2 * 2 * B * num_heads * N * N * HEAD_DIM     # QK^T + PV
             + 2 * B * N * D * D)                           # output projection
    cost = pl.CostEstimate(
        flops=int(flops),
        transcendentals=int(B * num_heads * N * N),         # softmax exps
        bytes_accessed=int(2 * nbytes(x) + nbytes(wqkv_t) + nbytes(wproj_t)
                           + nbytes(bqkv) + nbytes(bproj)))

    out = pl.pallas_call(
        kernel,
        out_shape=jax.ShapeDtypeStruct((B, N, D), x.dtype),
        grid_spec=pltpu.PrefetchScalarGridSpec(
            num_scalar_prefetch=0,
            grid=(B // TB,),
            in_specs=[
                pl.BlockSpec((TB, N, D), lambda b: (b, 0, 0)),
                _resident_spec((D, 3 * D)),                 # weights stay VMEM-resident,
                _resident_spec((1, 3 * D)),                 # single-buffered
                _resident_spec((D, D)),
                _resident_spec((1, D)),
            ],
            out_specs=pl.BlockSpec((TB, N, D), lambda b: (b, 0, 0)),
            scratch_shapes=[pltpu.VMEM((TB * N, D), wqkv_t.dtype)],   # head-output assembly
        ),
        compiler_params=pltpu.CompilerParams(
            dimension_semantics=("parallel",),
            # <= 48 MiB keeps headroom under v7x's 64 MiB physical VMEM while sitting well
            # above the 16/32 MiB scoped defaults; raise toward 64+ MiB on v5e/v6e together
            # with max_rows_per_step for even larger batch tiles.
            vmem_limit_bytes=vmem_limit_bytes,
        ),
        cost_estimate=cost,
    )(x, wqkv_t, bqkv, wproj_t, bproj)
    return out


def _reference_forward(x, qkv_w, qkv_b, proj_w, proj_b, subset_dim):
    """Pure-JAX reference of ModifiedAttention.forward (non-fused softmax path)."""
    B, N, C = x.shape
    num_heads = subset_dim // HEAD_DIM
    scale = float(HEAD_DIM) ** -0.5
    sub_qkv_w = jnp.concatenate(
        [qkv_w[:subset_dim, :subset_dim],
         qkv_w[FULL_DIM:FULL_DIM + subset_dim, :subset_dim],
         qkv_w[2 * FULL_DIM:2 * FULL_DIM + subset_dim, :subset_dim]], axis=0)
    sub_qkv_b = jnp.concatenate(
        [qkv_b[:subset_dim], qkv_b[FULL_DIM:FULL_DIM + subset_dim],
         qkv_b[2 * FULL_DIM:2 * FULL_DIM + subset_dim]], axis=0)
    qkv = x @ sub_qkv_w.T + sub_qkv_b                       # (B, N, 3*sd)
    qkv = qkv.reshape(B, N, 3, num_heads, HEAD_DIM).transpose(2, 0, 3, 1, 4)
    q, k, v = qkv[0], qkv[1], qkv[2]                        # (B, H, N, hd)
    attn = (q * scale) @ jnp.swapaxes(k, -2, -1)
    attn = jax.nn.softmax(attn, axis=-1)
    out = attn @ v                                          # (B, H, N, hd)
    out = out.transpose(0, 2, 1, 3).reshape(B, N, C)
    return out @ proj_w[:subset_dim, :subset_dim].T + proj_b[:subset_dim]


if __name__ == "__main__":
    key = jax.random.PRNGKey(0)
    k_x, k_qw, k_qb, k_pw, k_pb, k_x2 = jax.random.split(key, 6)

    # Full-size parameters (dim=768), deterministic synthetic init.
    qkv_w = jax.random.normal(k_qw, (3 * FULL_DIM, FULL_DIM), jnp.float32) * 0.02
    qkv_b = jax.random.normal(k_qb, (3 * FULL_DIM,), jnp.float32) * 0.02
    proj_w = jax.random.normal(k_pw, (FULL_DIM, FULL_DIM), jnp.float32) * 0.02
    proj_b = jax.random.normal(k_pb, (FULL_DIM,), jnp.float32) * 0.02

    # Small subnetwork configuration: subset_dim=128 -> 2 heads of 64; B=2, N=8 tokens.
    subset_dim = 128
    B, N = 2, 8
    x = jax.random.normal(k_x, (B, N, subset_dim), jnp.float32)

    # f32 MXU-operand path (tight parity check vs the pure-JAX f32 reference).
    # Note: pl.reciprocal(approx=True) makes this non-bit-exact vs an exact-division softmax.
    params_f32 = prepare_subnetwork_params(qkv_w, qkv_b, proj_w, proj_b, subset_dim,
                                           mxu_dtype=jnp.float32)
    out = modified_attention_forward(x, *params_f32)
    out = jax.block_until_ready(out)
    ref = _reference_forward(x, qkv_w, qkv_b, proj_w, proj_b, subset_dim)
    assert out.shape == (B, N, subset_dim)
    assert jnp.allclose(out, ref, atol=2e-3, rtol=2e-3), "mismatch vs pure-JAX reference (f32)"

    # bf16 MXU-operand path (recommended default on v5e/v6e/v7x; softmax/accumulation stay
    # f32 inside the kernel). Params are prepared ONCE and reused across calls.
    Bb, Nb = 4, 16
    params_bf16 = prepare_subnetwork_params(qkv_w, qkv_b, proj_w, proj_b, subset_dim,
                                            mxu_dtype=jnp.bfloat16)
    xb32 = jax.random.normal(k_x2, (Bb, Nb, subset_dim), jnp.float32)
    xb = xb32.astype(jnp.bfloat16)
    out_bf16 = modified_attention_forward(xb, *params_bf16)
    out_bf16 = jax.block_until_ready(out_bf16)
    ref_b = _reference_forward(xb.astype(jnp.float32), qkv_w, qkv_b, proj_w, proj_b, subset_dim)
    assert out_bf16.shape == (Bb, Nb, subset_dim)
    assert jnp.allclose(out_bf16.astype(jnp.float32), ref_b, atol=5e-2, rtol=5e-2), \
        "mismatch vs pure-JAX reference (bf16 operands)"

    print("KERNEL_OK")
</pallas_src>

<mosaic_0001>
module attributes {stable_mosaic.version = 11 : i64} {
  func.func @_attention_kernel(%arg0: i32, %arg1: memref<1x8x128xf32, #tpu.memory_space<vmem>>, %arg2: memref<128x384xf32, #tpu.memory_space<vmem>>, %arg3: memref<1x384xf32, #tpu.memory_space<vmem>>, %arg4: memref<128x128xf32, #tpu.memory_space<vmem>>, %arg5: memref<1x128xf32, #tpu.memory_space<vmem>>, %arg6: memref<1x8x128xf32, #tpu.memory_space<vmem>>, %arg7: memref<8x128xf32, #tpu.memory_space<vmem>>) attributes {dimension_semantics = [#tpu.dimension_semantics<parallel>], iteration_bounds = array<i64: 2>, scalar_prefetch = 0 : i64, scratch_operands = 1 : i64, tpu.core_type = #tpu.core_type<tc>, window_params = [{transform_indices = @transform_0, window_bounds = array<i64: 1, 8, 128>}, {pipeline_mode = #tpu.pipeline_mode<synchronous>, transform_indices = @transform_1, window_bounds = array<i64: 128, 384>}, {pipeline_mode = #tpu.pipeline_mode<synchronous>, transform_indices = @transform_2, window_bounds = array<i64: 1, 384>}, {pipeline_mode = #tpu.pipeline_mode<synchronous>, transform_indices = @transform_3, window_bounds = array<i64: 128, 128>}, {pipeline_mode = #tpu.pipeline_mode<synchronous>, transform_indices = @transform_4, window_bounds = array<i64: 1, 128>}, {transform_indices = @transform_5, window_bounds = array<i64: 1, 8, 128>}]} {
    %c0 = arith.constant 0 : index
    %c0_0 = arith.constant 0 : index
    %c0_1 = arith.constant 0 : index
    %0 = vector.load %arg1[%c0, %c0_0, %c0_1] : memref<1x8x128xf32, #tpu.memory_space<vmem>>, vector<1x8x128xf32>
    %1 = vector.shape_cast %0 : vector<1x8x128xf32> to vector<8x128xf32>
    %c0_2 = arith.constant 0 : index
    %c0_3 = arith.constant 0 : index
    %2 = vector.load %arg2[%c0_2, %c0_3] : memref<128x384xf32, #tpu.memory_space<vmem>>, vector<128x384xf32>
    %cst = arith.constant dense<0.000000e+00> : vector<8x384xf32>
    %3 = tpu.matmul %1, %2, %cst {dimension_numbers = #tpu.dot_dimension_numbers<[1], [0], [0], [1], [0, 0, 1, 1], [], []>} : vector<8x128xf32>, vector<128x384xf32>, vector<8x384xf32> -> vector<8x384xf32>
    %c0_4 = arith.constant 0 : index
    %c0_5 = arith.constant 0 : index
    %4 = vector.load %arg3[%c0_4, %c0_5] : memref<1x384xf32, #tpu.memory_space<vmem>>, vector<1x384xf32>
    %5 = vector.broadcast %4 : vector<1x384xf32> to vector<8x384xf32>
    %6 = arith.addf %3, %5 : vector<8x384xf32>
    %7 = vector.shape_cast %6 : vector<8x384xf32> to vector<1x8x384xf32>
    %8 = vector.extract_strided_slice %7 {offsets = [0, 0, 0], sizes = [1, 8, 64], strides = [1, 1, 1]} : vector<1x8x384xf32> to vector<1x8x64xf32>
    %9 = vector.extract_strided_slice %7 {offsets = [0, 0, 128], sizes = [1, 8, 64], strides = [1, 1, 1]} : vector<1x8x384xf32> to vector<1x8x64xf32>
    %10 = vector.extract_strided_slice %7 {offsets = [0, 0, 256], sizes = [1, 8, 64], strides = [1, 1, 1]} : vector<1x8x384xf32> to vector<1x8x64xf32>
    %cst_6 = arith.constant dense<0.000000e+00> : vector<1x8x8xf32>
    %11 = tpu.matmul %8, %9, %cst_6 {dimension_numbers = #tpu.dot_dimension_numbers<[2], [2], [1], [1], [0, 0, 0, 1, 1, 1], [0], [0]>} : vector<1x8x64xf32>, vector<1x8x64xf32>, vector<1x8x8xf32> -> vector<1x8x8xf32>
    %cst_7 = arith.constant dense<0xFF800000> : vector<1x8xf32>
    %12 = vector.multi_reduction <maximumf>, %11, %cst_7 [2] : vector<1x8x8xf32> to vector<1x8xf32>
    %13 = vector.shape_cast %12 : vector<1x8xf32> to vector<1x8x1xf32>
    %14 = vector.broadcast %13 : vector<1x8x1xf32> to vector<1x8x8xf32>
    %15 = arith.subf %11, %14 : vector<1x8x8xf32>
    %16 = math.exp %15 : vector<1x8x8xf32>
    %cst_8 = arith.constant dense<0.000000e+00> : vector<1x8xf32>
    %17 = vector.multi_reduction <add>, %16, %cst_8 [2] : vector<1x8x8xf32> to vector<1x8xf32>
    %18 = vector.shape_cast %17 : vector<1x8xf32> to vector<1x8x1xf32>
    %19 = tpu.reciprocal %18 {approx = true} : vector<1x8x1xf32> -> vector<1x8x1xf32>
    %20 = vector.broadcast %19 : vector<1x8x1xf32> to vector<1x8x8xf32>
    %21 = arith.mulf %16, %20 : vector<1x8x8xf32>
    %cst_9 = arith.constant dense<0.000000e+00> : vector<1x8x64xf32>
    %22 = tpu.matmul %21, %10, %cst_9 {dimension_numbers = #tpu.dot_dimension_numbers<[2], [1], [1], [2], [0, 0, 0, 1, 1, 2], [0], [0]>} : vector<1x8x8xf32>, vector<1x8x64xf32>, vector<1x8x64xf32> -> vector<1x8x64xf32>
    %23 = vector.shape_cast %22 : vector<1x8x64xf32> to vector<8x64xf32>
    %c0_10 = arith.constant 0 : index
    %c0_11 = arith.constant 0 : index
    %24 = vector.load %arg7[%c0_10, %c0_11] : memref<8x128xf32, #tpu.memory_space<vmem>>, vector<8x64xf32>
    tpu.vector_store %arg7[%c0_10, %c0_11], %23 {strides = array<i32>} : memref<8x128xf32, #tpu.memory_space<vmem>>, vector<8x64xf32>,
    %25 = vector.extract_strided_slice %7 {offsets = [0, 0, 64], sizes = [1, 8, 64], strides = [1, 1, 1]} : vector<1x8x384xf32> to vector<1x8x64xf32>
    %26 = vector.extract_strided_slice %7 {offsets = [0, 0, 192], sizes = [1, 8, 64], strides = [1, 1, 1]} : vector<1x8x384xf32> to vector<1x8x64xf32>
    %27 = vector.extract_strided_slice %7 {offsets = [0, 0, 320], sizes = [1, 8, 64], strides = [1, 1, 1]} : vector<1x8x384xf32> to vector<1x8x64xf32>
    %cst_12 = arith.constant dense<0.000000e+00> : vector<1x8x8xf32>
    %28 = tpu.matmul %25, %26, %cst_12 {dimension_numbers = #tpu.dot_dimension_numbers<[2], [2], [1], [1], [0, 0, 0, 1, 1, 1], [0], [0]>} : vector<1x8x64xf32>, vector<1x8x64xf32>, vector<1x8x8xf32> -> vector<1x8x8xf32>
    %cst_13 = arith.constant dense<0xFF800000> : vector<1x8xf32>
    %29 = vector.multi_reduction <maximumf>, %28, %cst_13 [2] : vector<1x8x8xf32> to vector<1x8xf32>
    %30 = vector.shape_cast %29 : vector<1x8xf32> to vector<1x8x1xf32>
    %31 = vector.broadcast %30 : vector<1x8x1xf32> to vector<1x8x8xf32>
    %32 = arith.subf %28, %31 : vector<1x8x8xf32>
    %33 = math.exp %32 : vector<1x8x8xf32>
    %cst_14 = arith.constant dense<0.000000e+00> : vector<1x8xf32>
    %34 = vector.multi_reduction <add>, %33, %cst_14 [2] : vector<1x8x8xf32> to vector<1x8xf32>
    %35 = vector.shape_cast %34 : vector<1x8xf32> to vector<1x8x1xf32>
    %36 = tpu.reciprocal %35 {approx = true} : vector<1x8x1xf32> -> vector<1x8x1xf32>
    %37 = vector.broadcast %36 : vector<1x8x1xf32> to vector<1x8x8xf32>
    %38 = arith.mulf %33, %37 : vector<1x8x8xf32>
    %cst_15 = arith.constant dense<0.000000e+00> : vector<1x8x64xf32>
    %39 = tpu.matmul %38, %27, %cst_15 {dimension_numbers = #tpu.dot_dimension_numbers<[2], [1], [1], [2], [0, 0, 0, 1, 1, 2], [0], [0]>} : vector<1x8x8xf32>, vector<1x8x64xf32>, vector<1x8x64xf32> -> vector<1x8x64xf32>
    %40 = vector.shape_cast %39 : vector<1x8x64xf32> to vector<8x64xf32>
    %c0_16 = arith.constant 0 : index
    %c64 = arith.constant 64 : index
    %41 = vector.load %arg7[%c0_16, %c64] : memref<8x128xf32, #tpu.memory_space<vmem>>, vector<8x64xf32>
    tpu.vector_store %arg7[%c0_16, %c64], %40 {strides = array<i32>} : memref<8x128xf32, #tpu.memory_space<vmem>>, vector<8x64xf32>,
    %c0_17 = arith.constant 0 : index
    %c0_18 = arith.constant 0 : index
    %42 = vector.load %arg7[%c0_17, %c0_18] : memref<8x128xf32, #tpu.memory_space<vmem>>, vector<8x128xf32>
    %c0_19 = arith.constant 0 : index
    %c0_20 = arith.constant 0 : index
    %43 = vector.load %arg4[%c0_19, %c0_20] : memref<128x128xf32, #tpu.memory_space<vmem>>, vector<128x128xf32>
    %cst_21 = arith.constant dense<0.000000e+00> : vector<8x128xf32>
    %44 = tpu.matmul %42, %43, %cst_21 {dimension_numbers = #tpu.dot_dimension_numbers<[1], [0], [0], [1], [0, 0, 1, 1], [], []>} : vector<8x128xf32>, vector<128x128xf32>, vector<8x128xf32> -> vector<8x128xf32>
    %c0_22 = arith.constant 0 : index
    %c0_23 = arith.constant 0 : index
    %45 = vector.load %arg5[%c0_22, %c0_23] : memref<1x128xf32, #tpu.memory_space<vmem>>, vector<1x128xf32>
    %46 = vector.broadcast %45 : vector<1x128xf32> to vector<8x128xf32>
    %47 = arith.addf %44, %46 : vector<8x128xf32>
    %48 = vector.shape_cast %47 : vector<8x128xf32> to vector<1x8x128xf32>
    %c0_24 = arith.constant 0 : index
    %c0_25 = arith.constant 0 : index
    %c0_26 = arith.constant 0 : index
    %49 = vector.load %arg6[%c0_24, %c0_25, %c0_26] : memref<1x8x128xf32, #tpu.memory_space<vmem>>, vector<1x8x128xf32>
    tpu.vector_store %arg6[%c0_24, %c0_25, %c0_26], %48 {strides = array<i32>} : memref<1x8x128xf32, #tpu.memory_space<vmem>>, vector<1x8x128xf32>,
    return
  }
  func.func @transform_0(%arg0: i32) -> (i32, i32, i32) {
    %c0_i32 = arith.constant 0 : i32
    %c0_i32_0 = arith.constant 0 : i32
    %c0_i32_1 = arith.constant 0 : i32
    return %arg0, %c0_i32, %c0_i32_0 : i32, i32, i32
  }
  func.func @transform_1(%arg0: i32) -> (i32, i32) {
    %c0_i32 = arith.constant 0 : i32
    %c0_i32_0 = arith.constant 0 : i32
    %c0_i32_1 = arith.constant 0 : i32
    return %c0_i32, %c0_i32_0 : i32, i32
  }
  func.func @transform_2(%arg0: i32) -> (i32, i32) {
    %c0_i32 = arith.constant 0 : i32
    %c0_i32_0 = arith.constant 0 : i32
    %c0_i32_1 = arith.constant 0 : i32
    return %c0_i32, %c0_i32_0 : i32, i32
  }
  func.func @transform_3(%arg0: i32) -> (i32, i32) {
    %c0_i32 = arith.constant 0 : i32
    %c0_i32_0 = arith.constant 0 : i32
    %c0_i32_1 = arith.constant 0 : i32
    return %c0_i32, %c0_i32_0 : i32, i32
  }
  func.func @transform_4(%arg0: i32) -> (i32, i32) {
    %c0_i32 = arith.constant 0 : i32
    %c0_i32_0 = arith.constant 0 : i32
    %c0_i32_1 = arith.constant 0 : i32
    return %c0_i32, %c0_i32_0 : i32, i32
  }
  func.func @transform_5(%arg0: i32) -> (i32, i32, i32) {
    %c0_i32 = arith.constant 0 : i32
    %c0_i32_0 = arith.constant 0 : i32
    %c0_i32_1 = arith.constant 0 : i32
    return %arg0, %c0_i32, %c0_i32_0 : i32, i32, i32
  }
}

</mosaic_0001>

<bundles_post_ra>
// kernel: tpu_custom_call.1
= control target key start
LH: loop header
LB: loop body
LE: loop exit
PB: predicated region body
PF: predicated region fallthrough
CT: control target
= control target key end

     0   :  { %10 = vsyncpa [#allocation4], 0  ;;  %s1817_s0 = inlined_call_operand.hbm [shape: f32[2,8,128], index: 0, kind: input, shape index: {}]   ;;  %s1818_s1 = inlined_call_operand.hbm [shape: f32[128,384], index: 1, kind: input, shape index: {}]   ;;  %s1819_s2 = inlined_call_operand.vmem [shape: f32[1,384], index: 2, kind: input, shape index: {}]   ;;  %s1820_s3 = inlined_call_operand.hbm [shape: f32[128,128], index: 3, kind: input, shape index: {}]   ;;  %s1821_s4 = inlined_call_operand.vmem [shape: f32[1,128], index: 4, kind: input, shape index: {}]   ;;  %s1822_s5 = inlined_call_operand.hbm [shape: f32[2,8,128], index: 5, kind: output, shape index: {}]  }
   0x1   :  { %12 = vsyncpa [#allocation4 + $0x1], 0 }
   0x2   :  { %13 = vsyncpa [#allocation7], 0 }
   0x3   :  { %14 = vsyncpa [#allocation5], 0 }
   0x4   :  { %16 = vsyncpa [#allocation5 + $0x1], 0  ;;  %s1527_s18 = smov 0   ;;  %s1529_s19 = smov 0  }
   0x5   :  { %s1531_s20 = smov 0   ;;  %s1533_s21 = smov 0  }
   0x6 LB: > { %s1548_s22 = sadd.s32 4294967295, %s1483_s21   ;;  %s1009_s23 = sadd.s32 4294967294, %s1483_s21   ;;  %s1483_s21 = sphi %s1533_s21, %s1842_s21   ;;  %s1479_s20 = sphi %s1531_s20, %s1841_s20   ;;  %s1475_s19 = sphi %s1529_s19, %s1840_s19   ;;  %s1471_s18 = sphi %s1527_s18, %s1839_s18  }
   0x7   : > { %p42_p0 = scmp.ne.s32.totalorder %s1475_s19, %s1471_s18  ;;  %p1823_p1 = scmp.eq.s32.totalorder %s1548_s22, 0 }
   0x8   : > { %p156_p3 = scmp.eq.s32.totalorder %s1009_s23, 1  ;;  %p1010_p5 = scmp.ge.s32.totalorder %s1483_s21, 1 }
   0x9   : > { %p1557_p4 = por %p1823_p1, %p42_p0  ;;  %p163_p7 = scmp.lt.s32.totalorder %s1483_s21, 3 }
   0xa   : > { %p1562_p6 = por %p156_p3, %p42_p0  ;;  %s1485_s27 = smov [#allocation6]  }
   0xb   : > { %s1826_s24 = scalar_select %p1557_p4, 1, 0 }
   0xc   : > { %s1827_s25 = scalar_select %p1562_p6, 1, 0 }
   0xd   : > { %p1567_p8 = pnand %p1010_p5, %p163_p7  ;;  %s175_s28 = sshll.u32 %s1485_s27, 4  ;;  %s1571_s28 = int_to_ptr.vmem [resolvable:$true] %s175_s28 }
   0xe   : > { %s1486_s30 = smov [#allocation8]   ;;  %s1327_s9 = scalar_lea.hbm %s1818_s1, 6144 }
   0xf   : > { %p1256_p9 = pneg %p1567_p8  ;;  %s191_s6 = sshll.u32 %s1486_s30, 4  ;;  %s1582_s6 = int_to_ptr.vmem [resolvable:$true] %s191_s6 }
  0x10   : > { %p1328_p12 = scmp.ne.s32.totalorder %s1818_s1, %s1327_s9  ;;  %p1334_p5 = scmp.lt.u32.totalorder %s1327_s9, %s1818_s1 }
  0x11   : > { %p1578_p11 = pnand %p1256_p9, %p1823_p1 }
  0x13   : > { %p1329_p13 = pneg %p1578_p11 }
  0x15   : > { %p1330_p0 = pnand %p1329_p13, %p1328_p12 }
  0x17   : > { %p1331_p3 = pneg %p1330_p0 }
  0x19   : > { %p1336_p7 = pnand %p1334_p5, %p1331_p3 }
  0x1b   : > { %1339 = shalt.err (!%p1336_p7)
}
  0x1c   : > { %s1340_s14 = scalar_lea.vmem %s1571_s28, 6144  ;;  %p1348_p2 = scmp.lt.s32.totalorder %s1571_s28, %s1571_s28 }
  0x1d   : > { %p1341_p9 = scmp.ne.s32.totalorder %s1571_s28, %s1340_s14  ;;  %p1349_p12 = scmp.lt.s32.totalorder %s1340_s14, %s1340_s14 }
  0x1f   : > { %p1343_p10 = pnand %p1341_p9, %p1329_p13  ;;  %p1350_p0 = por %p1349_p12, %p1348_p2 }
  0x21   : > { %p1344_p1 = pneg %p1343_p10 }
  0x23   : > { %p1351_p6 = pnand %p1350_p0, %p1344_p1 }
  0x25   : > { %1354 = shalt.err (!%p1351_p6)
}
  0x26   : > { %s1487_s15 = smov 384   ;;  %s1488_s16 = smov 24  }
  0x27   : > { %1259 = dma.hbm_to_vmem [thread:$0]  (!%p1578_p11), %s1818_s1, 6144, %s1571_s28, [#allocation7], %s1487_s15, %s1487_s15, %s1488_s16  }
  0x28   : > { %s1355_s7 = scalar_lea.hbm %s1820_s3, 2048 }
  0x29   : > { %p1356_p2 = scmp.ne.s32.totalorder %s1820_s3, %s1355_s7  ;;  %p1362_p10 = scmp.lt.u32.totalorder %s1355_s7, %s1820_s3 }
  0x2b   : > { %p1358_p1 = pnand %p1356_p2, %p1329_p13 }
  0x2d   : > { %p1359_p6 = pneg %p1358_p1 }
  0x2f   : > { %p1364_p3 = pnand %p1362_p10, %p1359_p6 }
  0x31   : > { %1367 = shalt.err (!%p1364_p3)
}
  0x32   : > { %s1368_s28 = scalar_lea.vmem %s1582_s6, 2048  ;;  %p1376_p12 = scmp.lt.s32.totalorder %s1582_s6, %s1582_s6 }
  0x33   : > { %p1369_p5 = scmp.ne.s32.totalorder %s1582_s6, %s1368_s28  ;;  %p1377_p0 = scmp.lt.s32.totalorder %s1368_s28, %s1368_s28 }
  0x35   : > { %p1371_p7 = pnand %p1369_p5, %p1329_p13  ;;  %p1378_p2 = por %p1377_p0, %p1376_p12 }
  0x37   : > { %p1372_p9 = pneg %p1371_p7 }
  0x39   : > { %p1379_p1 = pnand %p1378_p2, %p1372_p9 }
  0x3b   : > { %1382 = shalt.err (!%p1379_p1)
}
  0x3c   : > { %s1489_s12 = smov 128   ;;  %s1490_s13 = smov 8  }
  0x3d   : > { %1262 = dma.hbm_to_vmem [thread:$0]  (!%p1578_p11), %s1820_s3, 2048, %s1582_s6, [#allocation7], %s1489_s12, %s1489_s12, %s1490_s13  }
  0x3e   : > { %s1637_s16 = sadd.s32 1, %s1483_s21   ;;  %s29_s23 = sadd.s32 1, %s1479_s20 }
  0x3f   : > { %s26_s17 = ssub.s32 %s1483_s21, %s1637_s16  ;;  %p36_p6 = scmp.ne.s32.totalorder %s1479_s20, %s1475_s19 }
  0x40   : > { %p27_p13 = scmp.eq.s32.totalorder %s26_s17, 0  ;;  %p37_p10 = scmp.eq.s32.totalorder %s1483_s21, 0 }
  0x41   : > { %p1830_p5 = scmp.eq.s32.totalorder %s1548_s22, 1  ;;  %p1273_p9 = scmp.lt.s32.totalorder %s1483_s21, 2 }
  0x42   : > { %s1646_s27 = scalar_select %p27_p13, %s1479_s20, %s29_s23  }
  0x43   : > { %p38_p3 = por %p37_p10, %p36_p6  ;;  %p1650_p7 = por %p1830_p5, %p36_p6 }
  0x44   : > { %s208_s29 = sand.u32 1, %s1479_s20   ;;  %s1015_s6 = sshll.u32 %s1483_s21, 7 }
  0x45   : > { %s1831_s30 = scalar_select %p1650_p7, 1, 0 }
  0x46   : > { %s1014_s7 = sshll.u32 %s208_s29, 3  ;;  %s1660_s10 = scalar_lea.hbm %s1817_s0, %s1015_s6 }
  0x47   : > { %s212_s11 = scalar_lea.vmem [#allocation3], %s1014_s7  ;;  %p1664_p11 = pnand %p1273_p9, %p38_p3 }
  0x48   : > { %s219_s28 = sshll.u32 %s212_s11, 4  ;;  %s209_s13 = scalar_lea.sflag [#allocation4], %s208_s29  ;;  %s1662_s28 = int_to_ptr.vmem [resolvable:$true] %s219_s28 }
  0x49   : > { %s1383_s14 = scalar_lea.hbm %s1660_s10, 128  ;;  %p1385_p0 = pneg %p1664_p11 }
  0x4a   : > { %p1384_p12 = scmp.ne.s32.totalorder %s1660_s10, %s1383_s14  ;;  %s1388_s23 = scalar_lea.hbm %s1817_s0, 256 }
  0x4b   : > { %p1389_p13 = scmp.lt.u32.totalorder %s1660_s10, %s1817_s0  ;;  %p1390_p6 = scmp.lt.u32.totalorder %s1388_s23, %s1383_s14 }
  0x4c   : > { %p1386_p2 = pnand %p1385_p0, %p1384_p12  ;;  %p1392_p3 = scmp.lt.u32.totalorder %s1383_s14, %s1660_s10 }
  0x4d   : > { %p1391_p10 = por %p1390_p6, %p1389_p13 }
  0x4e   : > { %p1387_p1 = pneg %p1386_p2 }
  0x4f   : > { %p1393_p5 = por %p1392_p3, %p1391_p10 }
  0x51   : > { %p1394_p9 = pnand %p1393_p5, %p1387_p1 }
  0x53   : > { %1397 = shalt.err (!%p1394_p9)
}
  0x54   : > { %s1398_s29 = scalar_lea.vmem %s1662_s28, 128  ;;  %s1491_s8 = smov [#allocation3]  }
  0x55   : > { %p1399_p12 = scmp.ne.s32.totalorder %s1662_s28, %s1398_s29  ;;  %s1403_s9 = sshll.u32 %s1491_s8, 4  ;;  %s1404_s9 = int_to_ptr.vmem [resolvable:$false] %s1403_s9 }
  0x56   : > { %s1405_s11 = scalar_lea.vmem %s1404_s9, 256  ;;  %p1406_p4 = scmp.lt.s32.totalorder %s1662_s28, %s1404_s9 }
  0x57   : > { %p1401_p2 = pnand %p1399_p12, %p1385_p0  ;;  %p1407_p13 = scmp.lt.s32.totalorder %s1405_s11, %s1398_s29 }
  0x59   : > { %p1402_p7 = pneg %p1401_p2  ;;  %p1408_p6 = por %p1407_p13, %p1406_p4 }
  0x5b   : > { %p1409_p10 = pnand %p1408_p6, %p1402_p7 }
  0x5d   : > { %1412 = shalt.err (!%p1409_p10)
}
  0x5e   : > { %1266 = dma.hbm_to_vmem [thread:$0]  (!%p1664_p11), %s1660_s10, 128, %s1662_s28, %s209_s13  }
  0x5f   : > { %228 = sbr.rel (%p1567_p8) target bundleno = 1978 (0x7ba), region = 40  ;;  %s1696_s14 = sand.u32 (!%p1567_p8), 1, %s1475_s19  }
  0x60   : > { %s1017_s15 = sshll.u32 (!%p1567_p8), %s1696_s14, 3  ;;  %s231_s17 = scalar_lea.sflag (!%p1567_p8), [#allocation4], %s1696_s14 }
  0x61   : > { %s1702_s23 = scalar_lea.vmem (!%p1567_p8), [#allocation3], %s1017_s15  ;;  %p1833_p4 = scmp.ne.s32.totalorder (!%p1567_p8), %s1826_s24, 0 }
  0x66   : > { %1458 = dma.done.wait (%p1833_p4), %s231_s17, 128  }
  0x67   : > { %1460 = vsyncadd (%p1833_p4), %s231_s17, 4294967168  ;;  %p1834_p7 = scmp.eq.s32.totalorder %s1548_s22, 0 }
  0x69   : > { %1462 = dma.done.wait (%p1834_p7), [#allocation7], 8192   ;;  %p1835_p8 = pmov %p1834_p7 }
  0x6a   : > { %v1492_v0 = vmov 0.0   ;;  %v1493_v1 = vmov 0.0|0.0   ;;  %v271_v2 = vld [vmem:[#allocation6 + $0x8] sm:$0xff]  ;;  %v274_v3 = vld [vmem:[#allocation6 + $0x20] sm:$0xff]  ;;  %v273_v6 = vld [vmem:[#allocation6 + $0x18] sm:$0xff]  ;;  %vm1494_vm0 = vmmov 0  }
  0x6b   : > { %1464 = vsyncadd (%p1835_p8), [#allocation7], 4294959104  ;;  %399 = vmatprep.mubr.f32.mxu0 %v1492_v0  ;;  %1196 = vmatprep.subr.bf16.mxu1 %v1493_v1  ;;  %v270_v4 = vld [vmem:[#allocation6] sm:$0xff]  ;;  %v1164_v5 = vpack.c.bf16 %v274_v3, %v271_v2  ;;  %v277_v7 = vld [vmem:[#allocation6 + $0x38] sm:$0xff]  ;;  %vm476_vm1 = vcmask 523264   ;;  %s1495_s10 = smov 64  }
  0x6c   : > { %v280_v8 = vld [vmem:[#allocation6 + $0x50] sm:$0xff]  ;;  %v1166_v9 = vpack.c.bf16 %v273_v6, %v270_v4  ;;  %v279_v12 = vld [vmem:[#allocation6 + $0x48] sm:$0xff]  ;;  %v286_v14 = vld [vmem:[#allocation6 + $0x80] sm:$0xff]  ;;  %1106 = vmatprep.mubr.msk.f32.mxu1 %vm1494_vm0, %v1492_v0  ;;  %vm553_vm2 = vcmask 64512   ;;  %vm809_vm3 = vcmask 1048064   ;;  %s1029_s13 = sshll.u32 %s1548_s22, 7 }
  0x6d   : > { %v1168_v10 = vpack.c.bf16 %v280_v8, %v277_v7  ;;  %v276_v11 = vld [vmem:[#allocation6 + $0x30] sm:$0xff]  ;;  %v283_v13 = vld [vmem:[#allocation6 + $0x68] sm:$0xff]  ;;  %1165 = vmatprep.subr.bf16.mxu0 %v1164_v5  ;;  %v282_v17 = vld [vmem:[#allocation6 + $0x60] sm:$0xff]  ;;  %s268_s7 = scalar_lea.vmem [#allocation9], %s1017_s15  ;;  %s1773_s9 = scalar_lea.hbm %s1822_s5, %s1029_s13 }
  0x6e   : > { %1167 = vmatpush1.bf16.msra.mxu0 %v1166_v9  ;;  %v1170_v15 = vpack.c.bf16 %v279_v12, %v276_v11  ;;  %v1172_v16 = vpack.c.bf16 %v286_v14, %v283_v13  ;;  %v285_v18 = vld [vmem:[#allocation6 + $0x78] sm:$0xff]  ;;  %v292_v20 = vld [vmem:[#allocation6 + $0xb0] sm:$0xff]  ;;  %v291_v24 = vld [vmem:[#allocation6 + $0xa8] sm:$0xff]  ;;  %v320_v13 = vlaneseq  ;;  %s920_s6 = sshll.u32 %s268_s7, 4  ;;  %s907_s11 = scalar_lea.sflag [#allocation5], %s1696_s14  ;;  %s1775_s6 = int_to_ptr.vmem [resolvable:$true] %s920_s6 }
  0x6f   : > { %1169 = vmatprep.subr.bf16.mxu0 %v1168_v10  ;;  %v289_v19 = vld [vmem:[#allocation6 + $0x98] sm:$0xff]  ;;  %v1174_v21 = vpack.c.bf16 %v285_v18, %v282_v17  ;;  %v288_v23 = vld [vmem:[#allocation6 + $0x90] sm:$0xff]  ;;  %v295_v25 = vld [vmem:[#allocation6 + $0xc8] sm:$0xff]  ;;  %s1413_s17 = scalar_lea.vmem %s1775_s6, 128  ;;  %p1836_p0 = scmp.ne.s32.totalorder %s1831_s30, 0 }
  0x70   : > { %v1176_v22 = vpack.c.bf16 %v292_v20, %v289_v19  ;;  %v298_v26 = vld [vmem:[#allocation6 + $0xe0] sm:$0xff]  ;;  %v272_v27 = vld [vmem:[#allocation6 + $0x10] sm:$0xff]  ;;  %v275_v28 = vld [vmem:[#allocation6 + $0x28] sm:$0xff]  ;;  %v1178_v30 = vpack.c.bf16 %v291_v24, %v288_v23  ;;  %v321_v14 = vshrl.u32 %v320_v13, 7  ;;  %p1414_p11 = scmp.ne.s32.totalorder %s1775_s6, %s1413_s17  ;;  %s1496_s22 = smov [#allocation9]  }
  0x71   : > { %v278_v29 = vld [vmem:[#allocation6 + $0x40] sm:$0xff]  ;;  %v1197_v31 = vpack.c.bf16 %v275_v28, %v272_v27  ;;  %v281_v32 = vld [vmem:[#allocation6 + $0x58] sm:$0xff]  ;;  %v1180_v33 = vpack.c.bf16 %v298_v26, %v295_v25  ;;  %v304_v37 = vld [vmem:[#allocation6 + $0x110] sm:$0xff]  ;;  %s1417_s15 = sshll.u32 %s1496_s22, 4  ;;  %s1418_s15 = int_to_ptr.vmem [resolvable:$false] %s1417_s15 }
  0x72   : > { %1171 = vmatpush1.bf16.msra.mxu0 %v1170_v15  ;;  %v294_v34 = vld [vmem:[#allocation6 + $0xc0] sm:$0xff]  ;;  %v297_v35 = vld [vmem:[#allocation6 + $0xd8] sm:$0xff]  ;;  %v1200_v38 = vpack.c.bf16 %v281_v32, %v278_v29  ;;  %v284_v39 = vld [vmem:[#allocation6 + $0x70] sm:$0xff]  ;;  %v326_v15 = vsub.s32 1, %v321_v14  ;;  %v322_v17 = vsub.s32 0, %v321_v14  ;;  %v330_v24 = vsub.s32 2, %v321_v14  ;;  %p1415_p1 = pnand %p1414_p11, %p1836_p0  ;;  %p1420_p5 = scmp.lt.s32.totalorder %s1775_s6, %s1418_s15 }
  0x73   : > { %1173 = vmatprep.subr.bf16.mxu0 %v1172_v16  ;;  %v301_v36 = vld [vmem:[#allocation6 + $0xf8] sm:$0xff]  ;;  %1198 = vmatpush3.bf16.msra.mxu1 %v1197_v31  ;;  %v287_v40 = vld [vmem:[#allocation6 + $0x88] sm:$0xff]  ;;  %v1182_v41 = vpack.c.bf16 %v297_v35, %v294_v34  ;;  %v300_v43 = vld [vmem:[#allocation6 + $0xf0] sm:$0xff] }
  0x74   : > { %1199 = vmatprep.subr.bf16.mxu1 %v1493_v1  ;;  %v1184_v42 = vpack.c.bf16 %v304_v37, %v301_v36  ;;  %v303_v44 = vld [vmem:[#allocation6 + $0x108] sm:$0xff]  ;;  %v310_v46 = vld [vmem:[#allocation6 + $0x140] sm:$0xff]  ;;  %v1203_v47 = vpack.c.bf16 %v287_v40, %v284_v39  ;;  %v293_v49 = vld [vmem:[#allocation6 + $0xb8] sm:$0xff]  ;;  %p1416_p3 = pneg %p1415_p1 }
  0x75   : > { %v307_v45 = vld [vmem:[#allocation6 + $0x128] sm:$0xff]  ;;  %v290_v48 = vld [vmem:[#allocation6 + $0xa0] sm:$0xff]  ;;  %v1186_v50 = vpack.c.bf16 %v303_v44, %v300_v43  ;;  %v309_v53 = vld [vmem:[#allocation6 + $0x138] sm:$0xff] }
  0x76   : > { %1175 = vmatpush1.bf16.msra.mxu0 %v1174_v21  ;;  %v1188_v51 = vpack.c.bf16 %v310_v46, %v307_v45  ;;  %v306_v52 = vld [vmem:[#allocation6 + $0x120] sm:$0xff]  ;;  %v313_v54 = vld [vmem:[#allocation6 + $0x158] sm:$0xff]  ;;  %v316_v55 = vld [vmem:[#allocation6 + $0x170] sm:$0xff]  ;;  %v1206_v56 = vpack.c.bf16 %v293_v49, %v290_v48 }
  0x77   : > { %1177 = vmatprep.subr.bf16.mxu0 %v1176_v22  ;;  %1201 = vmatpush3.bf16.msra.mxu1 %v1200_v38  ;;  %v296_v57 = vld [vmem:[#allocation6 + $0xd0] sm:$0xff]  ;;  %v299_v58 = vld [vmem:[#allocation6 + $0xe8] sm:$0xff]  ;;  %v1190_v59 = vpack.c.bf16 %v309_v53, %v306_v52  ;;  %v1192_v60 = vpack.c.bf16 %v316_v55, %v313_v54  ;;  %v302_v2 = vld [vmem:[#allocation6 + $0x100] sm:$0xff] }
  0x78   : > { %1202 = vmatprep.subr.bf16.mxu1 %v1493_v1  ;;  %v312_v61 = vld [vmem:[#allocation6 + $0x150] sm:$0xff]  ;;  %v315_v62 = vld [vmem:[#allocation6 + $0x168] sm:$0xff]  ;;  %v1209_v63 = vpack.c.bf16 %v299_v58, %v296_v57  ;;  %v305_v3 = vld [vmem:[#allocation6 + $0x118] sm:$0xff] }
  0x79   : > { %v1194_v4 = vpack.c.bf16 %v315_v62, %v312_v61  ;;  %v1212_v5 = vpack.c.bf16 %v305_v3, %v302_v2  ;;  %v308_v6 = vld [vmem:[#allocation6 + $0x130] sm:$0xff]  ;;  %v311_v7 = vld [vmem:[#allocation6 + $0x148] sm:$0xff]  ;;  %v314_v10 = vld [vmem:[#allocation6 + $0x160] sm:$0xff] }
  0x7a   : > { %1179 = vmatpush1.bf16.msra.mxu0 %v1178_v30  ;;  %v269_v8 = vld [vmem:[%s1702_s23] sm:$0xff]  ;;  %v1215_v9 = vpack.c.bf16 %v311_v7, %v308_v6  ;;  %v318_v16 = vld [vmem:[%s1819_s2] sm:$0x7]  ;;  %v812_v55 = vld [vmem:[#allocation8] sm:$0xff]  ;;  %s1419_s23 = scalar_lea.vmem %s1418_s15, 256 }
  0x7b   : > { %1181 = vmatprep.subr.bf16.mxu0 %v1180_v33  ;;  %1204 = vmatpush3.bf16.msra.mxu1 %v1203_v47  ;;  %v317_v11 = vld [vmem:[#allocation6 + $0x178] sm:$0xff]  ;;  %v327_v18 = vrot.slane %v318_v16, %v326_v15  ;;  %v323_v20 = vrot.slane %v318_v16, %v322_v17  ;;  %v331_v25 = vrot.slane %v318_v16, %v330_v24  ;;  %v814_v57 = vld [vmem:[#allocation8 + $0x10] sm:$0xff]  ;;  %v816_v61 = vld [vmem:[#allocation8 + $0x20] sm:$0xff]  ;;  %p1421_p9 = scmp.lt.s32.totalorder %s1419_s23, %s1413_s17 }
  0x7c   : > { %1205 = vmatprep.subr.bf16.mxu1 %v1493_v1  ;;  %v1218_v12 = vpack.c.bf16 %v317_v11, %v314_v10  ;;  %v817_v62 = vld [vmem:[#allocation8 + $0x28] sm:$0xff]  ;;  %v818_v2 = vld [vmem:[#allocation8 + $0x30] sm:$0xff]  ;;  %v819_v3 = vld [vmem:[#allocation8 + $0x38] sm:$0xff] }
  0x7d   : > { %v821_v6 = vld [vmem:[#allocation8 + $0x48] sm:$0xff]  ;;  %v824_v11 = vld [vmem:[#allocation8 + $0x60] sm:$0xff]  ;;  %v826_v14 = vld [vmem:[#allocation8 + $0x70] sm:$0xff]  ;;  %p1422_p12 = por %p1421_p9, %p1420_p5 }
  0x7e   : > { %1183 = vmatpush1.bf16.msra.mxu0 %v1182_v41  ;;  %v827_v15 = vld [vmem:[#allocation8 + $0x78] sm:$0xff] }
  0x7f   : > { %1185 = vmatprep.subr.bf16.mxu0 %v1184_v42  ;;  %1207 = vmatpush3.bf16.msra.mxu1 %v1206_v56  ;;  %v813_v56 = vld [vmem:[#allocation8 + $0x8] sm:$0xff]  ;;  %v1242_v16 = vpack.c.bf16 %v827_v15, %v826_v14  ;;  %p1423_p2 = pnand %p1422_p12, %p1416_p3 }
  0x80   : > { %1208 = vmatprep.subr.bf16.mxu1 %v1493_v1  ;;  %v1221_v58 = vpack.c.bf16 %v813_v56, %v812_v55 }
  0x82   : > { %1187 = vmatpush1.bf16.msra.mxu0 %v1186_v50 }
  0x83   : > { %1189 = vmatprep.subr.bf16.mxu0 %v1188_v51  ;;  %1210 = vmatpush3.bf16.msra.mxu1 %v1209_v63  ;;  %v1227_v63 = vpack.c.bf16 %v817_v62, %v816_v61 }
  0x84   : > { %1211 = vmatprep.subr.bf16.mxu1 %v1493_v1 }
  0x86   : > { %1191 = vmatpush1.bf16.msra.mxu0 %v1190_v59  ;;  %v815_v59 = vld [vmem:[#allocation8 + $0x18] sm:$0xff] }
  0x87   : > { %1193 = vmatprep.subr.bf16.mxu0 %v1192_v60  ;;  %1213 = vmatpush3.bf16.msra.mxu1 %v1212_v5  ;;  %v1224_v60 = vpack.c.bf16 %v815_v59, %v814_v57  ;;  %v820_v5 = vld [vmem:[#allocation8 + $0x40] sm:$0xff] }
  0x88   : > { %1214 = vmatprep.subr.bf16.mxu1 %v1493_v1  ;;  %v1233_v7 = vpack.c.bf16 %v821_v6, %v820_v5 }
  0x8a   : > { %1195 = vmatpush1.bf16.msra.mxu0 %v1194_v4  ;;  %v1230_v4 = vpack.c.bf16 %v819_v3, %v818_v2 }
  0x8b   : > { %1220 = vmatprep.subr.bf16.mxu0 %v1493_v1  ;;  %1216 = vmatpush3.bf16.msra.mxu1 %v1215_v9  ;;  %v823_v9 = vld [vmem:[#allocation8 + $0x58] sm:$0xff] }
  0x8c   : > { %1217 = vmatprep.subr.bf16.mxu1 %v1493_v1 }
  0x8d   : > { %400 = vmatmul.mubr.f32.vlgmr.msra.gmra.mrb[0].mxu0 %v269_v8 }
  0x8e   : > { %1161 = vmatprep.mubr.msk.f32.mxu0 %vm1494_vm0, %v1492_v0  ;;  %1222 = vmatpush3.bf16.msra.mxu0 %v1221_v58 }
  0x8f   : > { %1219 = vmatpush3.bf16.msra.mxu1 %v1218_v12  ;;  %1223 = vmatprep.subr.bf16.mxu0 %v1493_v1  ;;  %v825_v12 = vld [vmem:[#allocation8 + $0x68] sm:$0xff] }
  0x90   : > { %1109 = vmatprep.subr.mxu1 %v1492_v0  ;;  %v1239_v13 = vpack.c.bf16 %v825_v12, %v824_v11 }
  0x92   : > { %1107 = vmatmul.mubr.f32.vlgmr.msra.gmra.mrb[0].mxu1 %v269_v8  ;;  %1225 = vmatpush3.bf16.msra.mxu0 %v1224_v60  ;;  %v822_v8 = vld [vmem:[#allocation8 + $0x50] sm:$0xff] }
  0x93   : > { %1111 = vmatprep.mubr.msk.f32.mxu1 %vm1494_vm0, %v1492_v0  ;;  %1226 = vmatprep.subr.bf16.mxu0 %v1493_v1  ;;  %v1236_v10 = vpack.c.bf16 %v823_v9, %v822_v8 }
  0x96   : > { %1228 = vmatpush3.bf16.msra.mxu0 %v1227_v63 }
  0x97   : > { %1229 = vmatprep.subr.bf16.mxu0 %v1493_v1 }
  0x9a   : > { %1231 = vmatpush3.bf16.msra.mxu0 %v1230_v4 }
  0x9b   : > { %1232 = vmatprep.subr.bf16.mxu0 %v1493_v1 }
  0x9e   : > { %1234 = vmatpush3.bf16.msra.mxu0 %v1233_v7 }
  0x9f   : > { %1235 = vmatprep.subr.bf16.mxu0 %v1493_v1 }
  0xa2   : > { %1237 = vmatpush3.bf16.msra.mxu0 %v1236_v10 }
  0xa3   : > { %1238 = vmatprep.subr.bf16.mxu0 %v1493_v1 }
  0xa6   : > { %1240 = vmatpush3.bf16.msra.mxu0 %v1239_v13 }
  0xa7   : > { %1241 = vmatprep.subr.bf16.mxu0 %v1493_v1 }
  0xaa   : > { %1243 = vmatpush3.bf16.msra.mxu0 %v1242_v16 }
 0x160   : > { %v401_v19 = vpop.f32.mrb[0].mxu0 }
 0x161   : > { %v403_v21 = vpop.f32.mrb[1].mxu0  ;;  %v402_v23 = vadd.f32 %v401_v19, %v323_v20 }
 0x162   : > { %v404_v22 = vadd.f32 %v403_v21, %v327_v18  ;;  %v1027_v21 = vld [vmem:[%s1821_s4] ss:$0 sm:$0xff] }
 0x164   : > { %641 = vrot.lane.b32.xlu1 %v404_v22, %s1495_s10  ;;  %1110 = vmatpush3.xpose.msk.msra.mxu1 %vm476_vm1, %v404_v22 }
 0x165   : > { %1114 = vmatprep.subr.mxu1 %v1492_v0  ;;  %v472_v26 = vpop.f32.mrb[0].mxu1 }
 0x166   : > { %v473_v27 = vadd.f32 %v472_v26, %v331_v25  ;;  %v1108_v28 = vpop.f32.mrb[1].mxu1 }
 0x167   : > { %1112 = vmatmul.mubr.msk.f32.vlgmr.msra.gmra.mrb[2].mxu1 %vm476_vm1, %v402_v23 }
 0x168   : > { %639 = vrot.lane.b32.xlu1 %v402_v23, %s1495_s10  ;;  %1116 = vmatprep.mubr.msk.f32.mxu1 %vm1494_vm0, %v1492_v0 }
 0x169   : > { %1115 = vmatpush3.msra.mxu1 %v473_v27 }
 0x16a   : > { %1119 = vmatprep.subr.mxu1 %v1492_v0 }
 0x1d6   : > { %v642_v39 = vpop.permute.xlu1 %641 }
 0x1da   : > { %v640_v41 = vpop.permute.xlu1 %639 }
 0x23a   : > { %v549_v29 = vpop.f32.mrb[2].mxu1 }
 0x23b   : > { %v1113_v30 = vpop.f32.mrb[3].mxu1  ;;  %v554_v31 = vsel %vm553_vm2, %v549_v29, -inf }
 0x23c   : > { %555 = vmax.xlane.f32.xlu0 %v554_v31 }
 0x2c9   : > { %v556_v32 = vpop.xlane.xlu0 %555 }
 0x2ca   : > { %v557_v33 = vsub.f32 %v549_v29, %v556_v32 }
 0x2cc   : > { %v558_v34 = vmul.f32 1.442695, %v557_v33 }
 0x2ce   : > { %1319 = vpow2.f32 %v558_v34 }
 0x2d8   : > { %v1320_v35 = vpop.eup %1319 }
 0x2d9   : > { %v560_v36 = vsel %vm553_vm2, %v1320_v35, 0.0 }
 0x2da   : > { %561 = vadd.xlane.f32.xlu0 %v560_v36 }
 0x367   : > { %v562_v37 = vpop.xlane.xlu0 %561 }
 0x368   : > { %1321 = vrcp.f32 %v562_v37 }
 0x372   : > { %v1322_v38 = vpop.eup %1321 }
 0x373   : > { %v564_v40 = vmul.f32 %v1322_v38, %v1320_v35 }
 0x375   : > { %1117 = vmatmul.mubr.msk.f32.vlgmr.msra.gmra.mrb[4].mxu1 %vm553_vm2, %v564_v40 }
 0x376   : > { %1120 = vmatpush3.xpose.msk.msra.mxu1 %vm476_vm1, %v642_v39  ;;  %1121 = vmatprep.mubr.msk.f32.mxu1 %vm1494_vm0, %v1492_v0 }
 0x377   : > { %1124 = vmatprep.subr.mxu1 %v1492_v0 }
 0x379   : > { %1122 = vmatmul.mubr.msk.f32.vlgmr.msra.gmra.mrb[6].mxu1 %vm476_vm1, %v640_v41 }
 0x37a   : > { %1126 = vmatprep.mubr.msk.f32.mxu1 %vm1494_vm0, %v1492_v0 }
 0x448   : > { %v634_v42 = vpop.f32.mrb[4].mxu1 }
 0x449   : > { %638 = vst.msk [vmem:[#allocation2] sm:$0xff] %vm476_vm1, %v634_v42  ;;  %v1118_v43 = vpop.f32.mrb[5].mxu1 }
 0x44c   : > { %v713_v44 = vpop.f32.mrb[6].mxu1 }
 0x44d   : > { %v1123_v45 = vpop.f32.mrb[7].mxu1  ;;  %v717_v46 = vsel %vm553_vm2, %v713_v44, -inf }
 0x44e   : > { %718 = vmax.xlane.f32.xlu0 %v717_v46 }
 0x464   : > { %729 = vrot.lane.b32.xlu0 %v473_v27, %s1495_s10 }
 0x4db   : > { %v719_v47 = vpop.xlane.xlu0 %718 }
 0x4dc   : > { %v720_v48 = vsub.f32 %v713_v44, %v719_v47 }
 0x4de   : > { %v721_v49 = vmul.f32 1.442695, %v720_v48 }
 0x4df   : > { %v730_v50 = vpop.permute.xlu0 %729 }
 0x4e0   : > { %1323 = vpow2.f32 %v721_v49  ;;  %1125 = vmatpush3.msra.mxu1 %v730_v50 }
 0x4ea   : > { %v1324_v51 = vpop.eup %1323 }
 0x4eb   : > { %v723_v0 = vsel %vm553_vm2, %v1324_v51, 0.0 }
 0x4ec   : > { %724 = vadd.xlane.f32.xlu1 %v723_v0 }
 0x579   : > { %v725_v52 = vpop.xlane.xlu1 %724 }
 0x57a   : > { %1325 = vrcp.f32 %v725_v52 }
 0x584   : > { %v1326_v53 = vpop.eup %1325 }
 0x585   : > { %v727_v54 = vmul.f32 %v1326_v53, %v1324_v51 }
 0x587   : > { %1127 = vmatmul.mubr.msk.f32.vlgmr.msra.gmra.mrb[8].mxu1 %vm553_vm2, %v727_v54 }
 0x65a   : > { %v801_v17 = vpop.f32.mrb[8].mxu1 }
 0x65b   : > { %806 = vrot.lane.b32.xlu0 %v801_v17, %s1495_s10  ;;  %v1128_v18 = vpop.f32.mrb[9].mxu1 }
 0x6cd   : > { %v807_v19 = vpop.permute.xlu0 %806 }
 0x6ce   : > { %810 = vst.msk [vmem:[#allocation2] sm:$0xff] %vm809_vm3, %v807_v19 }
 0x6d5   : > { %v811_v20 = vld [vmem:[#allocation2] sm:$0xff] }
 0x6d6   : > { %1162 = vmatmul.mubr.f32.vlgmr.msra.gmra.mrb[2].mxu0 %v811_v20 }
 0x7a9   : > { %v901_v1 = vpop.f32.mrb[2].mxu0 }
 0x7aa   : > { %v902_v22 = vadd.f32 %v1027_v21, %v901_v1  ;;  %v1163_v23 = vpop.f32.mrb[3].mxu0 }
 0x7ac   : > { %905 = vst [vmem:[%s268_s7] sm:$0xff] %v902_v22 }
 0x7ad   : > { %1426 = shalt.err (!%p1423_p2)
}
 0x7ae   : > { %s1427_s14 = scalar_lea.hbm %s1773_s9, 128  ;;  %s1431_s10 = scalar_lea.hbm %s1822_s5, 256 }
 0x7af   : > { %p1428_p13 = scmp.ne.s32.totalorder %s1773_s9, %s1427_s14  ;;  %p1432_p4 = scmp.lt.u32.totalorder %s1773_s9, %s1822_s5 }
 0x7b0   : > { %p1433_p7 = scmp.lt.u32.totalorder %s1431_s10, %s1427_s14  ;;  %p1435_p11 = scmp.lt.u32.totalorder %s1427_s14, %s1773_s9 }
 0x7b1   : > { %p1429_p6 = pnand %p1428_p13, %p1836_p0 }
 0x7b2   : > { %p1434_p8 = por %p1433_p7, %p1432_p4 }
 0x7b3   : > { %p1430_p10 = pneg %p1429_p6 }
 0x7b4   : > { %p1436_p1 = por %p1435_p11, %p1434_p8 }
 0x7b6   : > { %p1437_p3 = pnand %p1436_p1, %p1430_p10 }
 0x7b8   : > { %1440 = shalt.err (!%p1437_p3)
}
 0x7b9   : > { %1254 = dma.vmem_to_hbm [thread:$0]  (%p1836_p0), %s1775_s6, 128, %s1773_s9, %s907_s11  }
 0x7ba PF: > { %s932_s13 = sand.u32 1, %s1471_s18   ;;  %p1837_p5 = scmp.ne.s32.totalorder %s1827_s25, 0 }
 0x7bb   : > { %p1838_p9 = scmp.ge.s32.totalorder %s1483_s21, 2  ;;  %s933_s7 = scalar_lea.sflag [#allocation5], %s932_s13 }
 0x7bd   : > { %p1268_p12 = pnand %p1838_p9, %p1837_p5 }
 0x7bf   : > { %1466 = dma.done.wait (!%p1268_p12), %s933_s7, 128  }
 0x7c0   : > { %1468 = vsyncadd (!%p1268_p12), %s933_s7, 4294967168  ;;  %p19_p2 = scmp.ge.s32.totalorder %s1637_s16, 4   ;;  %s1839_s18 = smov %s1475_s19 }
 0x7c1   : > { %s1840_s19 = smov %s1479_s20  ;;  %s1841_s20 = smov %s1646_s27 }
 0x7c2   : > { %s1842_s21 = smov %s1637_s16  ;;  %21 = sbr.rel (!%p19_p2) target bundleno = 6 (0x6), region = 93 }
 0x7c9   :  { %938 = vsyncpa [#allocation4], 1 }
 0x7ca   :  { %940 = vsyncpa [#allocation4 + $0x1], 1 }
 0x7cb   :  { %941 = vsyncpa [#allocation7], 1 }
 0x7cc   :  { %942 = vsyncpa [#allocation5], 1 }
 0x7cd   :  { %944 = vsyncpa [#allocation5 + $0x1], 1 }

</bundles_post_ra>
